<compile_context>
chip_gen: v5e
topology: v5e:2x2
jax: 0.10.0
libtpu: 0.0.40
codegen_flags: <defaults>
</compile_context>

<pallas_src>
import functools

import jax
import jax.numpy as jnp
from jax import lax
from jax.experimental import pallas as pl
from jax.experimental.pallas import tpu as pltpu

_ROW_CAP = 1024            # max rows per tile (512-1024 already saturates HBM)


def _round_up(x, m):
    return ((x + m - 1) // m) * m


def _soft_ce_kernel(x_ref, t_ref, o_ref, *, n_rows, tb):
    """(tb, C) logits + (tb, C) soft targets -> lane-dense block partial.

    Ragged rows in the last block are masked with a row iota (their contents are
    undefined, but row-wise reductions keep any garbage confined to those rows).
    """
    i = pl.program_id(0)
    x = x_ref[...].astype(jnp.float32)
    t = t_ref[...].astype(jnp.float32)

    m = jnp.max(x, axis=1, keepdims=True)                               # (tb, 1)
    shifted = x - m
    lse = jnp.log(jnp.sum(jnp.exp(shifted), axis=1, keepdims=True))     # (tb, 1)

    # sum_c(-t*(shifted - lse)) == sum_c(t)*lse - sum_c(t*shifted)
    sum_t = jnp.sum(t, axis=1, keepdims=True)                           # (tb, 1)
    sum_ts = jnp.sum(t * shifted, axis=1, keepdims=True)                # (tb, 1)
    per_row = sum_t * lse - sum_ts                                      # (tb, 1)

    row = lax.broadcasted_iota(jnp.int32, per_row.shape, 0)
    valid = (i * tb + row) < n_rows
    block = jnp.sum(jnp.where(valid, per_row, 0.0))

    sub = lax.broadcasted_iota(jnp.int32, (8, 128), 0)
    lane = lax.broadcasted_iota(jnp.int32, (8, 128), 1)
    o_ref[0] = jnp.where((sub == 0) & (lane == 0), block, 0.0)


def _hard_ce_kernel(x_ref, y_ref, o_ref, *, n_rows, tb):
    """(tb, C) logits + (tb, 1) int32 labels -> lane-dense block partial.

    Per-row loss is logsumexp(x) - x[label], computed without materializing a
    one-hot target.  Ragged rows in the last block are masked with a row iota.
    """
    i = pl.program_id(0)
    x = x_ref[...].astype(jnp.float32)
    y = y_ref[...]                                                      # (tb, 1)

    m = jnp.max(x, axis=1, keepdims=True)
    shifted = x - m
    lse = jnp.log(jnp.sum(jnp.exp(shifted), axis=1, keepdims=True))     # (tb, 1)

    col = lax.broadcasted_iota(jnp.int32, x.shape, 1)
    picked = jnp.sum(jnp.where(col == y, shifted, 0.0), axis=1, keepdims=True)
    per_row = lse - picked                                              # (tb, 1)

    row = lax.broadcasted_iota(jnp.int32, per_row.shape, 0)
    valid = (i * tb + row) < n_rows
    block = jnp.sum(jnp.where(valid, per_row, 0.0))

    sub = lax.broadcasted_iota(jnp.int32, (8, 128), 0)
    lane = lax.broadcasted_iota(jnp.int32, (8, 128), 1)
    o_ref[0] = jnp.where((sub == 0) & (lane == 0), block, 0.0)


def _vmem_caps():
    """(tile budget, vmem_limit cap) in bytes, per TPU generation."""
    try:
        kind = jax.devices()[0].device_kind.lower()
    except Exception:
        kind = ""
    if ("v5" in kind) or ("v6" in kind):
        return 48 * 1024 * 1024, 112 * 1024 * 1024   # 128 MiB physical VMEM
    return 26 * 1024 * 1024, 56 * 1024 * 1024        # conservative (v7x: 64 MiB)


def cutmix_cross_entropy_loss(logits, target, size_average=True):
    """JAX/Pallas equivalent of CutMixCrossEntropyLoss.forward.

    logits: (N, C) float (any float dtype; upcast to f32 in-kernel).
    target: (N,) int labels OR (N, C) soft targets.
    """
    n, c = logits.shape
    hard = (target.ndim == 1)

    # ---- Tile sizing: account for double-buffered inputs + f32 intermediates ----
    cp = max(_round_up(c, 128), 128)                 # lane-padded width in VMEM
    per_row = 2 * cp * logits.dtype.itemsize         # logits, double-buffered
    per_row += 3 * cp * 4                            # f32 upcast/shifted/exp work set
    if hard:
        per_row += 2 * 8                             # (tb, 1) int32 labels (tiny)
    else:
        per_row += 2 * cp * target.dtype.itemsize    # soft targets, double-buffered
        per_row += cp * 4                            # f32 upcast of targets

    budget, vmem_cap = _vmem_caps()
    tb = max(8, min(budget // per_row, _ROW_CAP))
    tb = (tb // 8) * 8
    # Target ~8 grid blocks: megacore sharding (v7x) + DMA/compute overlap (all gens).
    tb = min(tb, max(8, _round_up(pl.cdiv(n, 8), 8)))
    tb = max(8, tb)
    num_blocks = pl.cdiv(n, tb)

    if hard:
        second = target.astype(jnp.int32).reshape(n, 1)
        second_spec = pl.BlockSpec((tb, 1), lambda i: (i, 0))
        kernel = functools.partial(_hard_ce_kernel, n_rows=n, tb=tb)
    else:
        second = target
        second_spec = pl.BlockSpec((tb, c), lambda i: (i, 0))
        kernel = functools.partial(_soft_ce_kernel, n_rows=n, tb=tb)

    out_bytes = num_blocks * 8 * 128 * 4
    cost = pl.CostEstimate(
        flops=5 * n * c,
        transcendentals=n * c + n,
        bytes_accessed=(logits.size * logits.dtype.itemsize
                        + second.size * second.dtype.itemsize
                        + out_bytes),
    )

    vmem_limit = min(vmem_cap, tb * per_row + 8 * 1024 * 1024)

    partials = pl.pallas_call(
        kernel,
        out_shape=jax.ShapeDtypeStruct((num_blocks, 8, 128), jnp.float32),
        grid_spec=pltpu.PrefetchScalarGridSpec(
            num_scalar_prefetch=0,
            grid=(num_blocks,),
            in_specs=[
                pl.BlockSpec((tb, c), lambda i: (i, 0)),
                second_spec,
            ],
            out_specs=pl.BlockSpec((1, 8, 128), lambda i: (i, 0, 0)),
        ),
        compiler_params=pltpu.CompilerParams(
            dimension_semantics=("parallel",),
            vmem_limit_bytes=vmem_limit,
        ),
        cost_estimate=cost,
    )(logits, second)

    total = jnp.sum(partials)
    if size_average:
        total = total / jnp.float32(n)
    return total


def _reference_loss(logits, target, size_average=True):
    """Pure-JAX reference mirroring the PyTorch cross_entropy()."""
    if target.ndim == 1:
        target = jax.nn.one_hot(target, logits.shape[-1], dtype=jnp.float32)
    log_sm = jax.nn.log_softmax(logits.astype(jnp.float32), axis=1)
    per_row = jnp.sum(-target.astype(jnp.float32) * log_sm, axis=1)
    return jnp.mean(per_row) if size_average else jnp.sum(per_row)


if __name__ == "__main__":
    key = jax.random.PRNGKey(0)
    k1, k2, k3, k4, k5 = jax.random.split(key, 5)

    # Cases 1 & 2: N=16, C=32 (class axis not a multiple of 128 -> compiler lane pad).
    N, C = 16, 32
    logits = jax.random.normal(k1, (N, C), dtype=jnp.float32) * 2.0
    labels = jax.random.randint(k2, (N,), 0, C, dtype=jnp.int32)
    soft = jax.nn.softmax(jax.random.normal(k3, (N, C), dtype=jnp.float32), axis=1)

    loss_hard = jax.block_until_ready(
        cutmix_cross_entropy_loss(logits, labels, size_average=True))
    loss_soft = jax.block_until_ready(
        cutmix_cross_entropy_loss(logits, soft, size_average=False))
    assert jnp.allclose(loss_hard, _reference_loss(logits, labels, True),
                        rtol=1e-5, atol=1e-5), (loss_hard,)
    assert jnp.allclose(loss_soft, _reference_loss(logits, soft, False),
                        rtol=1e-5, atol=1e-5), (loss_soft,)

    # Cases 3 & 4: ragged shapes (N=20, C=40) exercise in-kernel row masking.
    N2, C2 = 20, 40
    logits2 = jax.random.normal(k4, (N2, C2), dtype=jnp.float32)
    labels2 = jax.random.randint(k5, (N2,), 0, C2, dtype=jnp.int32)
    soft2 = jax.nn.softmax(logits2 * 0.5, axis=1)

    loss_h2 = jax.block_until_ready(
        cutmix_cross_entropy_loss(logits2, labels2, size_average=True))
    loss_s2 = jax.block_until_ready(
        cutmix_cross_entropy_loss(logits2, soft2, size_average=True))
    assert jnp.allclose(loss_h2, _reference_loss(logits2, labels2, True),
                        rtol=1e-5, atol=1e-5), (loss_h2,)
    assert jnp.allclose(loss_s2, _reference_loss(logits2, soft2, True),
                        rtol=1e-5, atol=1e-5), (loss_s2,)

    print("KERNEL_OK")
</pallas_src>

<mosaic_0001>
module attributes {stable_mosaic.version = 11 : i64} {
  func.func @_hard_ce_kernel(%arg0: i32, %arg1: memref<8x32xf32, #tpu.memory_space<vmem>>, %arg2: memref<8x1xi32, #tpu.memory_space<vmem>>, %arg3: memref<1x8x128xf32, #tpu.memory_space<vmem>>) attributes {dimension_semantics = [#tpu.dimension_semantics<parallel>], iteration_bounds = array<i64: 2>, scalar_prefetch = 0 : i64, scratch_operands = 0 : i64, tpu.core_type = #tpu.core_type<tc>, window_params = [{transform_indices = @transform_0, window_bounds = array<i64: 8, 32>}, {transform_indices = @transform_1, window_bounds = array<i64: 8, 1>}, {transform_indices = @transform_2, window_bounds = array<i64: 1, 8, 128>}]} {
    %c0 = arith.constant 0 : index
    %c0_0 = arith.constant 0 : index
    %0 = vector.load %arg1[%c0, %c0_0] : memref<8x32xf32, #tpu.memory_space<vmem>>, vector<8x32xf32>
    %c0_1 = arith.constant 0 : index
    %c0_2 = arith.constant 0 : index
    %1 = vector.load %arg2[%c0_1, %c0_2] : memref<8x1xi32, #tpu.memory_space<vmem>>, vector<8x1xi32>
    %cst = arith.constant dense<0xFF800000> : vector<8xf32>
    %2 = vector.multi_reduction <maximumf>, %0, %cst [1] : vector<8x32xf32> to vector<8xf32>
    %3 = vector.shape_cast %2 : vector<8xf32> to vector<8x1xf32>
    %4 = vector.broadcast %3 : vector<8x1xf32> to vector<8x32xf32>
    %5 = arith.subf %0, %4 : vector<8x32xf32>
    %6 = math.exp %5 : vector<8x32xf32>
    %cst_3 = arith.constant dense<0.000000e+00> : vector<8xf32>
    %7 = vector.multi_reduction <add>, %6, %cst_3 [1] : vector<8x32xf32> to vector<8xf32>
    %8 = vector.shape_cast %7 : vector<8xf32> to vector<8x1xf32>
    %9 = math.log %8 : vector<8x1xf32>
    %10 = tpu.iota {dimensions = array<i32: 1>} : vector<8x32xi32>
    %11 = vector.broadcast %1 : vector<8x1xi32> to vector<8x32xi32>
    %12 = arith.cmpi eq, %10, %11 : vector<8x32xi32>
    %cst_4 = arith.constant 0.000000e+00 : f32
    %13 = vector.broadcast %cst_4 : f32 to vector<8x32xf32>
    %14 = arith.select %12, %5, %13 : vector<8x32xi1>, vector<8x32xf32>
    %cst_5 = arith.constant dense<0.000000e+00> : vector<8xf32>
    %15 = vector.multi_reduction <add>, %14, %cst_5 [1] : vector<8x32xf32> to vector<8xf32>
    %16 = vector.shape_cast %15 : vector<8xf32> to vector<8x1xf32>
    %17 = arith.subf %9, %16 : vector<8x1xf32>
    %18 = tpu.iota {dimensions = array<i32: 0>} : vector<8x1xi32>
    %c8_i32 = arith.constant 8 : i32
    %19 = arith.muli %arg0, %c8_i32 : i32
    %20 = vector.broadcast %19 : i32 to vector<8x1xi32>
    %21 = arith.addi %20, %18 : vector<8x1xi32>
    %c16_i32 = arith.constant 16 : i32
    %22 = vector.broadcast %c16_i32 : i32 to vector<8x1xi32>
    %23 = arith.cmpi slt, %21, %22 : vector<8x1xi32>
    %cst_6 = arith.constant 0.000000e+00 : f32
    %24 = vector.broadcast %cst_6 : f32 to vector<8x1xf32>
    %25 = arith.select %23, %17, %24 : vector<8x1xi1>, vector<8x1xf32>
    %26 = vector.shape_cast %25 : vector<8x1xf32> to vector<1x8x1xf32>
    %cst_7 = arith.constant dense<0.000000e+00> : vector<1xf32>
    %27 = vector.multi_reduction <add>, %26, %cst_7 [1, 2] : vector<1x8x1xf32> to vector<1xf32>
    %28 = vector.shape_cast %27 : vector<1xf32> to vector<1x1x1xf32>
    %29 = vector.extract %28[0, 0, 0] : f32 from vector<1x1x1xf32>
    %30 = tpu.iota {dimensions = array<i32: 0>} : vector<8x128xi32>
    %31 = tpu.iota {dimensions = array<i32: 1>} : vector<8x128xi32>
    %c0_i32 = arith.constant 0 : i32
    %32 = vector.broadcast %c0_i32 : i32 to vector<8x128xi32>
    %33 = arith.cmpi eq, %30, %32 : vector<8x128xi32>
    %c0_i32_8 = arith.constant 0 : i32
    %34 = vector.broadcast %c0_i32_8 : i32 to vector<8x128xi32>
    %35 = arith.cmpi eq, %31, %34 : vector<8x128xi32>
    %36 = arith.andi %33, %35 : vector<8x128xi1>
    %cst_9 = arith.constant 0.000000e+00 : f32
    %37 = vector.broadcast %29 : f32 to vector<8x128xf32>
    %38 = vector.broadcast %cst_9 : f32 to vector<8x128xf32>
    %39 = arith.select %36, %37, %38 : vector<8x128xi1>, vector<8x128xf32>
    %c0_10 = arith.constant 0 : index
    %c0_11 = arith.constant 0 : index
    %c0_12 = arith.constant 0 : index
    %40 = vector.load %arg3[%c0_10, %c0_11, %c0_12] : memref<1x8x128xf32, #tpu.memory_space<vmem>>, vector<1x8x128xf32>
    %41 = vector.shape_cast %40 : vector<1x8x128xf32> to vector<8x128xf32>
    %42 = vector.shape_cast %39 : vector<8x128xf32> to vector<1x8x128xf32>
    tpu.vector_store %arg3[%c0_10, %c0_11, %c0_12], %42 {strides = array<i32>} : memref<1x8x128xf32, #tpu.memory_space<vmem>>, vector<1x8x128xf32>,
    return
  }
  func.func @transform_0(%arg0: i32) -> (i32, i32) {
    %c0_i32 = arith.constant 0 : i32
    %c0_i32_0 = arith.constant 0 : i32
    return %arg0, %c0_i32 : i32, i32
  }
  func.func @transform_1(%arg0: i32) -> (i32, i32) {
    %c0_i32 = arith.constant 0 : i32
    %c0_i32_0 = arith.constant 0 : i32
    return %arg0, %c0_i32 : i32, i32
  }
  func.func @transform_2(%arg0: i32) -> (i32, i32, i32) {
    %c0_i32 = arith.constant 0 : i32
    %c0_i32_0 = arith.constant 0 : i32
    %c0_i32_1 = arith.constant 0 : i32
    return %arg0, %c0_i32, %c0_i32_0 : i32, i32, i32
  }
}

</mosaic_0001>

<bundles_post_ra>
// kernel: tpu_custom_call.1
= control target key start
LH: loop header
LB: loop body
LE: loop exit
PB: predicated region body
PF: predicated region fallthrough
CT: control target
= control target key end

     0   :  { %7 = vsyncpa [#allocation3], 0  ;;  %s522_s0 = inlined_call_operand.vmem [shape: f32[16,32], index: 0, kind: input, shape index: {}]   ;;  %s523_s1 = inlined_call_operand.vmem [shape: s32[16,1], index: 1, kind: input, shape index: {}]   ;;  %s524_s2 = inlined_call_operand.hbm [shape: f32[2,8,128], index: 2, kind: output, shape index: {}]  }
   0x1   :  { %9 = vsyncpa [#allocation3 + $0x1], 0  ;;  %s431_s9 = smov 0   ;;  %s433_s10 = smov 0  }
   0x2   :  { %s435_s11 = smov 0   ;;  %s437_s12 = smov 0  }
   0x3 LB: > { %s452_s13 = sadd.s32 4294967295, %s413_s12   ;;  %s292_s14 = sadd.s32 4294967294, %s413_s12   ;;  %s413_s12 = sphi %s437_s12, %s530_s12   ;;  %s409_s11 = sphi %s435_s11, %s529_s11   ;;  %s405_s10 = sphi %s433_s10, %s528_s10   ;;  %s401_s9 = sphi %s431_s9, %s527_s9  }
   0x4   : > { %s456_s15 = sadd.s32 1, %s413_s12   ;;  %s74_s16 = sadd.s32 1, %s409_s11 }
   0x5   : > { %s71_s17 = ssub.s32 %s413_s12, %s456_s15  ;;  %p84_p0 = scmp.ne.s32.totalorder %s409_s11, %s405_s10 }
   0x6   : > { %p72_p1 = scmp.eq.s32.totalorder %s71_s17, 0  ;;  %p85_p2 = scmp.eq.s32.totalorder %s452_s13, 1 }
   0x7   : > { %p90_p3 = scmp.ne.s32.totalorder %s405_s10, %s401_s9  ;;  %p91_p4 = scmp.eq.s32.totalorder %s292_s14, 1 }
   0x8   : > { %s467_s18 = scalar_select %p72_p1, %s409_s11, %s74_s16  }
   0x9   : > { %p469_p5 = por %p85_p2, %p84_p0  ;;  %p473_p6 = por %p91_p4, %p90_p3 }
   0xa   : > { %p295_p7 = scmp.ge.s32.totalorder %s413_s12, 1  ;;  %p123_p8 = scmp.lt.s32.totalorder %s413_s12, 3 }
   0xc   : > { %p124_p9 = pnand %p295_p7, %p123_p8 }
   0xd   : > { %p148_p10 = scmp.lt.s32.totalorder (!%p124_p9), %s452_s13, 1  ;;  %s299_s29 = sshll.u32 (!%p124_p9), %s452_s13, 3 }
   0xe   : > { %127 = sbr.rel (%p124_p9) target bundleno = 466 (0x1d2), region = 28  ;;  %s145_s30 = sand.u32 (!%p124_p9), 1, %s405_s10  }
   0xf   : > { %s296_s3 = sshll.u32 (!%p124_p9), %s145_s30, 3  ;;  %s216_s6 = scalar_lea.hbm (!%p124_p9), %s524_s2, %s299_s29 }
  0x10   : > { %s147_s7 = scalar_lea.vmem (!%p124_p9), [#allocation2], %s296_s3  ;;  %s206_s16 = scalar_lea.sflag (!%p124_p9), [#allocation3], %s145_s30 }
  0x11   : > { %s218_s8 = sshll.u32 (!%p124_p9), %s147_s7, 4  ;;  %s371_s24 = scalar_lea.hbm (!%p124_p9), %s524_s2, 16  ;;  %s219_s8 = int_to_ptr.vmem [resolvable:$true] %s218_s8 }
  0x13   : > { %v415_v0 = vmov 0   ;;  %s149_s21 = scalar_select %p148_p10, %s452_s13, 1  ;;  %vm158_vm0 = vcmask 261120   ;;  %v170_v9 = vlaneseq  ;;  %v184_v16 = vstv %s299_s29 }
  0x14   : > { %346 = vset.pattern.permute.xlu0 %v415_v0  ;;  %vm188_vm3 = vcmask 7168   ;;  %s220_s13 = sshll.u32 %s216_s6, 4  ;;  %s221_s13 = int_to_ptr.hbm [resolvable:$true] %s220_s13 }
  0x15   : > { %s297_s22 = sshll.u32 %s149_s21, 3  ;;  %v171_v10 = vand.u32 127, %v170_v9  ;;  %v182_v15 = vshrl.u32 %v170_v9, 7  ;;  %s365_s17 = sshra.s32 %s221_s13, 4  ;;  %s366_s17 = int_to_ptr.hbm [resolvable:$true] %s365_s17 }
  0x16   : > { %s151_s25 = scalar_lea.vmem %s522_s0, %s297_s22  ;;  %s155_s28 = scalar_lea.vmem %s523_s1, %s297_s22 }
  0x17   : > { %v156_v1 = vld [vmem:[%s151_s25] sm:$0xff]  ;;  %v185_v17 = vadd.s32 %v184_v16, %v182_v15  ;;  %vm199_vm4 = vcmp.eq.s32.totalorder %v182_v15, 0  ;;  %vm200_vm5 = vcmp.eq.s32.totalorder %v171_v10, 0  ;;  %s367_s21 = scalar_lea.hbm %s366_s17, 8  ;;  %p372_p0 = scmp.lt.s32.totalorder %s366_s17, %s524_s2 }
  0x18   : > { %v159_v2 = vsel %vm158_vm0, %v156_v1, -inf  ;;  %v157_v3 = vld [vmem:[%s155_s28] sm:$0xff]  ;;  %vm201_vm6 = vmand %vm199_vm4, %vm200_vm5  ;;  %p368_p11 = scmp.ne.s32.totalorder %s366_s17, %s367_s21  ;;  %p373_p1 = scmp.lt.s32.totalorder %s371_s24, %s367_s21 }
  0x19   : > { %160 = vmax.xlane.f32.xlu0 %v159_v2  ;;  %vm186_vm2 = vcmp.lt.s32.totalorder %v185_v17, 16 }
  0x1a   : > { %p369_p12 = pnand %p368_p11, %p469_p5  ;;  %p374_p2 = por %p373_p1, %p372_p0 }
  0x1c   : > { %p370_p13 = pneg %p369_p12 }
  0x1e   : > { %p375_p3 = pnand %p374_p2, %p370_p13 }
  0x2d   : > { %173 = vperm.xlu0 %346, %v157_v3  }
  0x8c   : > { %v161_v4 = vpop.xlane.xlu0 %160 }
  0x8d   : > { %v162_v5 = vsub.f32 %v156_v1, %v161_v4 }
  0x8f   : > { %v163_v6 = vmul.f32 1.442695, %v162_v5 }
  0x91   : > { %347 = vpow2.f32 %v163_v6 }
  0x97   : > { %v348_v7 = vpop.eup %347 }
  0x98   : > { %v165_v8 = vsel %vm158_vm0, %v348_v7, 0.0 }
  0x99   : > { %166 = vadd.xlane.f32.xlu1 %v165_v8 }
  0x9f   : > { %v174_v11 = vpop.permute.xlu0 %173 }
  0xa0   : > { %vm175_vm1 = vcmp.eq.s32.totalorder %v171_v10, %v174_v11 }
  0xa1   : > { %v176_v12 = vsel %vm175_vm1, %v162_v5, 0.0 }
  0xa2   : > { %v177_v13 = vsel %vm158_vm0, %v176_v12, 0.0 }
  0xa3   : > { %178 = vadd.xlane.f32.xlu1 %v177_v13 }
 0x10c   : > { %v167_v14 = vpop.xlane.xlu1 %166 }
 0x10d   : > { %349 = vlog2.f32 %v167_v14 }
 0x113   : > { %v350_v18 = vpop.eup %349 }
 0x114   : > { %v169_v19 = vmul.f32 0.6931472, %v350_v18 }
 0x116   : > { %v179_v20 = vpop.xlane.xlu1 %178 }
 0x117   : > { %v180_v21 = vsub.f32 %v169_v19, %v179_v20 }
 0x119   : > { %v187_v22 = vsel %vm186_vm2, %v180_v21, 0.0 }
 0x11a   : > { %v189_v23 = vsel %vm188_vm3, %v187_v22, 0.0 }
 0x11b   : > { %190 = vadd.xlane.f32.xlu2 %v189_v23 }
 0x18e   : > { %v191_v24 = vpop.xlane.xlu2 %190 }
 0x18f   : > { %v192_v25 = vrot.slane %v191_v24, 4 }
 0x191   : > { %v193_v26 = vadd.f32 %v192_v25, %v191_v24 }
 0x193   : > { %v194_v27 = vrot.slane %v193_v26, 2 }
 0x195   : > { %v195_v28 = vadd.f32 %v194_v27, %v193_v26 }
 0x197   : > { %v196_v29 = vrot.slane %v195_v28, 1 }
 0x199   : > { %v197_v30 = vadd.f32 %v196_v29, %v195_v28 }
 0x19b   : > { %304 = vpush %v197_v30 }
 0x1cc   : > { %s305_s14 = spop %304 }
 0x1cd   : > { %v202_v31 = vstv %s305_s14 }
 0x1ce   : > { %v203_v32 = vsel %vm201_vm6, %v202_v31, 0.0 }
 0x1cf   : > { %204 = vst [vmem:[%s147_s7] sm:$0xff] %v203_v32 }
 0x1d0   : > { %378 = shalt.err (!%p375_p3)
}
 0x1d1   : > { %306 = dma.vmem_to_hbm [thread:$0]  (%p469_p5), %s219_s8, 128, %s221_s13, %s206_s16  }
 0x1d2 PF: > { %p312_p4 = scmp.ge.s32.totalorder %s413_s12, 2  ;;  %s232_s27 = sand.u32 1, %s401_s9  }
 0x1d3   : > { %s233_s28 = scalar_lea.sflag [#allocation3], %s232_s27 }
 0x1d4   : > { %p309_p7 = pnand %p312_p4, %p473_p6 }
 0x1d6   : > { %p310_p8 = pneg %p309_p7 }
 0x1d8   : > { %396 = dma.done.wait (%p310_p8), %s233_s28, 128  }
 0x1d9   : > { %398 = vsyncadd (%p310_p8), %s233_s28, 4294967168  ;;  %p12_p9 = scmp.ge.s32.totalorder %s456_s15, 4   ;;  %s527_s9 = smov %s405_s10 }
 0x1da   : > { %s528_s10 = smov %s409_s11  ;;  %s529_s11 = smov %s467_s18 }
 0x1db   : > { %s530_s12 = smov %s456_s15  ;;  %14 = sbr.rel (!%p12_p9) target bundleno = 3 (0x3), region = 66 }
 0x1e0   :  { %239 = vsyncpa [#allocation3], 1 }
 0x1e1   :  { %241 = vsyncpa [#allocation3 + $0x1], 1 }

</bundles_post_ra>
